<compile_context>
chip_gen: v5e
topology: v5e:2x2
jax: 0.10.0
libtpu: 0.0.40
codegen_flags: <defaults>
</compile_context>

<pallas_src>
import functools

import jax
import jax.numpy as jnp
import numpy as np
from jax.experimental import pallas as pl
from jax.experimental.pallas import tpu as pltpu


def _round_up(x, m):
    return (x + m - 1) // m * m


def _choose_batch_tile(B, D, H, n_abs, vmem_budget_bytes=16 * 1024 * 1024):
    """Pick a batch tile (multiple of 16) whose working set fits the VMEM budget.

    Budget is deliberately conservative so full double-buffering of the streamed
    blocks survives on every generation (v7x has only 64 MiB physical VMEM).
    """
    # Streamed (double-buffered) per-row bytes: x (bf16), gumbel (f32), out (bf16).
    streamed_row = 2 * (2 * D + 4 * n_abs + 2 * n_abs)
    # Single-buffered per-row temporaries: phi (f32 + bf16 copy) and z (f32).
    temp_row = (4 + 2) * H + 4 * n_abs
    # Resident weights/biases (bf16 W1/W2, f32 biases); x2 as double-buffer pessimism.
    weight_bytes = 2 * (2 * D * H + 2 * H * n_abs + 4 * (H + n_abs))
    usable = max(vmem_budget_bytes - weight_bytes, 16 * (streamed_row + temp_row))
    tb = int(usable // (streamed_row + temp_row))
    tb = max(16, min(tb, 1024))
    tb = (tb // 16) * 16              # bf16 sublane-tiling friendly
    if B <= tb:
        return max(16, _round_up(B, 16))   # single tile: block spans the full padded batch
    return tb


def _encoder_kernel(x_ref, w1_ref, b1_ref, w2_ref, b2_ref, g_ref, out_ref, *,
                    base, n_groups):
    G = n_groups

    # body: Linear + ReLU. bf16 operands, f32 accumulation on the MXU.
    phi = jnp.maximum(
        jnp.dot(x_ref[...], w1_ref[...], preferred_element_type=jnp.float32)
        + b1_ref[...],
        0.0,
    )

    # fc_head fused into a single lane-dense matmul over all n_abs columns.
    # W2 / b2 / gumbel were pre-permuted (wrapper) to c-major order, so the
    # within-group offset c lives in the contiguous lane slice [c*G, (c+1)*G).
    # NOTE: hard_sample's /temperature divide is dropped: argmax is invariant
    # under division by tau > 0 and only the hard one-hot is returned.
    z = (jnp.dot(phi.astype(w2_ref.dtype), w2_ref[...],
                 preferred_element_type=jnp.float32)
         + b2_ref[...] + g_ref[...])

    # Streaming group max over the `base` lane slices (base is a small static int).
    m = z[:, 0:G]
    for c in range(1, base):
        m = jnp.maximum(m, z[:, c * G:(c + 1) * G])

    # Hard one-hot with 'lowest index wins' tie-break (matches torch/jnp argmax).
    chosen = jnp.zeros_like(m, dtype=jnp.bool_)
    pieces = []
    for c in range(base):
        z_c = z[:, c * G:(c + 1) * G]
        is_max = jnp.logical_and(z_c == m, jnp.logical_not(chosen))
        pieces.append(is_max.astype(out_ref.dtype))
        chosen = jnp.logical_or(chosen, is_max)

    # Single lane-dense store of the whole (TB, n_abs) output block.
    out_ref[...] = jnp.concatenate(pieces, axis=-1)


def sample_abstract_encoder_forward(x, w1, b1, w2, b2, gumbel, *, base, tau,
                                    out_dtype=jnp.bfloat16):
    """TSANet abs_encoder forward: hard one-hot sample of shape (B, n_abs).

    `tau` is accepted for API parity with the PyTorch module but unused: the
    hard-sample forward value is argmax((logits + gumbel) / tau) per group,
    which is invariant for any tau > 0.
    """
    del tau
    B, D = x.shape
    H = w1.shape[1]
    n_abs = w2.shape[1]
    assert n_abs % base == 0
    G = n_abs // base

    # ---- one-time wrapper-side layout work (plain JAX) ---------------------
    # c-major column permutation: column (c*G + g) of W2_cm is PyTorch column
    # (g*base + c).  The kernel then reads each within-group offset c as one
    # contiguous lane slice of a single fused matmul result.
    w2_cm = jnp.transpose(w2.reshape(H, G, base), (0, 2, 1)).reshape(H, n_abs)
    b2_cm = jnp.transpose(b2.reshape(G, base), (1, 0)).reshape(1, n_abs)
    g_cm = jnp.transpose(gumbel.reshape(B, G, base), (0, 2, 1)).reshape(B, n_abs)

    # bf16 MXU operands; accumulation stays f32 inside the kernel.
    x_bf = x.astype(jnp.bfloat16)
    w1_bf = w1.astype(jnp.bfloat16)
    w2_bf = w2_cm.astype(jnp.bfloat16)
    b1_f = b1.reshape(1, H).astype(jnp.float32)
    b2_f = b2_cm.astype(jnp.float32)
    g_f = g_cm.astype(jnp.float32)

    # ---- batch tiling -------------------------------------------------------
    TB = _choose_batch_tile(B, D, H, n_abs)
    B_pad = _round_up(B, TB)
    if B_pad != B:
        pad = B_pad - B
        x_bf = jnp.pad(x_bf, ((0, pad), (0, 0)))
        g_f = jnp.pad(g_f, ((0, pad), (0, 0)))

    kernel = functools.partial(_encoder_kernel, base=base, n_groups=G)

    out_cm = pl.pallas_call(
        kernel,
        out_shape=jax.ShapeDtypeStruct((B_pad, n_abs), out_dtype),
        grid=(B_pad // TB,),
        in_specs=[
            pl.BlockSpec((TB, D), lambda i: (i, 0)),        # x: streamed per batch tile
            pl.BlockSpec((D, H), lambda i: (0, 0)),         # W1: VMEM-resident
            pl.BlockSpec((1, H), lambda i: (0, 0)),         # b1: VMEM-resident
            pl.BlockSpec((H, n_abs), lambda i: (0, 0)),     # W2 (c-major): resident
            pl.BlockSpec((1, n_abs), lambda i: (0, 0)),     # b2 (c-major): resident
            pl.BlockSpec((TB, n_abs), lambda i: (i, 0)),    # gumbel (c-major): streamed
        ],
        out_specs=pl.BlockSpec((TB, n_abs), lambda i: (i, 0)),
        compiler_params=pltpu.CompilerParams(
            dimension_semantics=("parallel",),              # megacore on v7x
            # Safe on every generation (<= half of v7x's 64 MiB physical VMEM);
            # TB is sized so the working set stays well inside this.
            vmem_limit_bytes=32 * 1024 * 1024,
        ),
    )(x_bf, w1_bf, b1_f, w2_bf, b2_f, g_f)

    # Un-permute the lane-dense c-major output back to PyTorch group-major order:
    # column (g*base + c)  <-  column (c*G + g).   (cheap, done once, in XLA)
    out_cm = out_cm[:B]
    return jnp.transpose(out_cm.reshape(B, base, G), (0, 2, 1)).reshape(B, n_abs)


if __name__ == "__main__":
    # Small shapes consistent with the module; H and n_abs chosen 128-aligned per
    # the perf review (MXU-friendly contraction / output dims).
    B, D_in, H = 8, 16, 128         # batch, state dim, body.feature_dim
    n_abs, base = 256, 2            # n_abs % base == 0
    tau = 0.5                       # temperature.cur (forward result is tau-invariant)

    key = jax.random.PRNGKey(0)
    kx, kw1, kb1, kw2, kb2, kg = jax.random.split(key, 6)

    # Deterministic synthetic parameters (layer_init-style small gaussians).
    x = jax.random.normal(kx, (B, D_in), jnp.float32)
    w1 = jax.random.normal(kw1, (D_in, H), jnp.float32) * 0.3
    b1 = jax.random.normal(kb1, (H,), jnp.float32) * 0.05
    w2 = jax.random.normal(kw2, (H, n_abs), jnp.float32) * 0.3
    b2 = jax.random.normal(kb2, (n_abs,), jnp.float32) * 0.05
    # Gumbel noise for hard_sample (deterministic via PRNGKey).
    gumbel = jax.random.gumbel(kg, (B, n_abs), jnp.float32)

    out = sample_abstract_encoder_forward(x, w1, b1, w2, b2, gumbel,
                                          base=base, tau=tau)
    out = jax.block_until_ready(out)
    out_f32 = np.asarray(out.astype(jnp.float32))

    # Pure-JAX reference of the same forward pass, using the SAME bf16 operand
    # casts as the kernel (f32 accumulation), so argmax decisions match exactly.
    G = n_abs // base
    phi_ref = jnp.maximum(
        jnp.dot(x.astype(jnp.bfloat16), w1.astype(jnp.bfloat16),
                preferred_element_type=jnp.float32) + b1, 0.0)
    logits_ref = jnp.dot(phi_ref.astype(jnp.bfloat16), w2.astype(jnp.bfloat16),
                         preferred_element_type=jnp.float32) + b2
    z_ref = logits_ref.reshape(B, G, base) + gumbel.reshape(B, G, base)
    idx_ref = jnp.argmax(z_ref, axis=2)
    ref = jax.nn.one_hot(idx_ref, base, dtype=jnp.float32).reshape(B, n_abs)

    np.testing.assert_allclose(out_f32, np.asarray(ref), atol=0.0)
    assert out.shape == (B, n_abs)
    # Each group of `base` columns is a one-hot.
    np.testing.assert_allclose(
        out_f32.reshape(B, G, base).sum(-1), np.ones((B, G)))

    print("KERNEL_OK")
</pallas_src>

<mosaic_0001>
module attributes {stable_mosaic.version = 11 : i64} {
  func.func @_encoder_kernel(%arg0: i32, %arg1: memref<16x16xbf16, #tpu.memory_space<vmem>>, %arg2: memref<16x128xbf16, #tpu.memory_space<vmem>>, %arg3: memref<1x128xf32, #tpu.memory_space<vmem>>, %arg4: memref<128x256xbf16, #tpu.memory_space<vmem>>, %arg5: memref<1x256xf32, #tpu.memory_space<vmem>>, %arg6: memref<16x256xf32, #tpu.memory_space<vmem>>, %arg7: memref<16x256xbf16, #tpu.memory_space<vmem>>) attributes {dimension_semantics = [#tpu.dimension_semantics<parallel>], iteration_bounds = array<i64: 1>, scalar_prefetch = 0 : i64, scratch_operands = 0 : i64, tpu.core_type = #tpu.core_type<tc>, window_params = [{transform_indices = @transform_0, window_bounds = array<i64: 16, 16>}, {pipeline_mode = #tpu.pipeline_mode<synchronous>, transform_indices = @transform_1, window_bounds = array<i64: 16, 128>}, {pipeline_mode = #tpu.pipeline_mode<synchronous>, transform_indices = @transform_2, window_bounds = array<i64: 1, 128>}, {pipeline_mode = #tpu.pipeline_mode<synchronous>, transform_indices = @transform_3, window_bounds = array<i64: 128, 256>}, {pipeline_mode = #tpu.pipeline_mode<synchronous>, transform_indices = @transform_4, window_bounds = array<i64: 1, 256>}, {transform_indices = @transform_5, window_bounds = array<i64: 16, 256>}, {transform_indices = @transform_6, window_bounds = array<i64: 16, 256>}]} {
    %c0 = arith.constant 0 : index
    %c0_0 = arith.constant 0 : index
    %0 = vector.load %arg1[%c0, %c0_0] : memref<16x16xbf16, #tpu.memory_space<vmem>>, vector<16x16xbf16>
    %c0_1 = arith.constant 0 : index
    %c0_2 = arith.constant 0 : index
    %1 = vector.load %arg2[%c0_1, %c0_2] : memref<16x128xbf16, #tpu.memory_space<vmem>>, vector<16x128xbf16>
    %cst = arith.constant dense<0.000000e+00> : vector<16x128xf32>
    %2 = tpu.matmul %0, %1, %cst {dimension_numbers = #tpu.dot_dimension_numbers<[1], [0], [0], [1], [0, 0, 1, 1], [], []>} : vector<16x16xbf16>, vector<16x128xbf16>, vector<16x128xf32> -> vector<16x128xf32>
    %c0_3 = arith.constant 0 : index
    %c0_4 = arith.constant 0 : index
    %3 = vector.load %arg3[%c0_3, %c0_4] : memref<1x128xf32, #tpu.memory_space<vmem>>, vector<1x128xf32>
    %4 = vector.broadcast %3 : vector<1x128xf32> to vector<16x128xf32>
    %5 = arith.addf %2, %4 : vector<16x128xf32>
    %cst_5 = arith.constant 0.000000e+00 : f32
    %6 = vector.broadcast %cst_5 : f32 to vector<16x128xf32>
    %7 = arith.maximumf %5, %6 : vector<16x128xf32>
    %8 = arith.truncf %7 : vector<16x128xf32> to vector<16x128xbf16>
    %c0_6 = arith.constant 0 : index
    %c0_7 = arith.constant 0 : index
    %9 = vector.load %arg4[%c0_6, %c0_7] : memref<128x256xbf16, #tpu.memory_space<vmem>>, vector<128x256xbf16>
    %cst_8 = arith.constant dense<0.000000e+00> : vector<16x256xf32>
    %10 = tpu.matmul %8, %9, %cst_8 {dimension_numbers = #tpu.dot_dimension_numbers<[1], [0], [0], [1], [0, 0, 1, 1], [], []>} : vector<16x128xbf16>, vector<128x256xbf16>, vector<16x256xf32> -> vector<16x256xf32>
    %c0_9 = arith.constant 0 : index
    %c0_10 = arith.constant 0 : index
    %11 = vector.load %arg5[%c0_9, %c0_10] : memref<1x256xf32, #tpu.memory_space<vmem>>, vector<1x256xf32>
    %12 = vector.broadcast %11 : vector<1x256xf32> to vector<16x256xf32>
    %13 = arith.addf %10, %12 : vector<16x256xf32>
    %c0_11 = arith.constant 0 : index
    %c0_12 = arith.constant 0 : index
    %14 = vector.load %arg6[%c0_11, %c0_12] : memref<16x256xf32, #tpu.memory_space<vmem>>, vector<16x256xf32>
    %15 = arith.addf %13, %14 : vector<16x256xf32>
    %16 = vector.extract_strided_slice %15 {offsets = [0, 0], sizes = [16, 128], strides = [1, 1]} : vector<16x256xf32> to vector<16x128xf32>
    %17 = vector.extract_strided_slice %15 {offsets = [0, 128], sizes = [16, 128], strides = [1, 1]} : vector<16x256xf32> to vector<16x128xf32>
    %18 = arith.maximumf %16, %17 : vector<16x128xf32>
    %false = arith.constant false
    %19 = vector.broadcast %false : i1 to vector<16x128xi1>
    %20 = vector.extract_strided_slice %15 {offsets = [0, 0], sizes = [16, 128], strides = [1, 1]} : vector<16x256xf32> to vector<16x128xf32>
    %21 = arith.cmpf oeq, %20, %18 : vector<16x128xf32>
    %cst_13 = arith.constant dense<true> : vector<16x128xi1>
    %22 = arith.xori %19, %cst_13 : vector<16x128xi1>
    %23 = arith.andi %21, %22 : vector<16x128xi1>
    %24 = arith.extui %23 : vector<16x128xi1> to vector<16x128xi32>
    %25 = arith.sitofp %24 : vector<16x128xi32> to vector<16x128xf32>
    %26 = arith.truncf %25 : vector<16x128xf32> to vector<16x128xbf16>
    %27 = arith.ori %19, %23 : vector<16x128xi1>
    %28 = vector.extract_strided_slice %15 {offsets = [0, 128], sizes = [16, 128], strides = [1, 1]} : vector<16x256xf32> to vector<16x128xf32>
    %29 = arith.cmpf oeq, %28, %18 : vector<16x128xf32>
    %cst_14 = arith.constant dense<true> : vector<16x128xi1>
    %30 = arith.xori %27, %cst_14 : vector<16x128xi1>
    %31 = arith.andi %29, %30 : vector<16x128xi1>
    %32 = arith.extui %31 : vector<16x128xi1> to vector<16x128xi32>
    %33 = arith.sitofp %32 : vector<16x128xi32> to vector<16x128xf32>
    %34 = arith.truncf %33 : vector<16x128xf32> to vector<16x128xbf16>
    %35 = tpu.concatenate %26, %34 in 1 : vector<16x128xbf16>, vector<16x128xbf16> -> vector<16x256xbf16>
    %c0_15 = arith.constant 0 : index
    %c0_16 = arith.constant 0 : index
    %36 = vector.load %arg7[%c0_15, %c0_16] : memref<16x256xbf16, #tpu.memory_space<vmem>>, vector<16x256xbf16>
    tpu.vector_store %arg7[%c0_15, %c0_16], %35 {strides = array<i32>} : memref<16x256xbf16, #tpu.memory_space<vmem>>, vector<16x256xbf16>,
    return
  }
  func.func @transform_0(%arg0: i32) -> (i32, i32) {
    %c0_i32 = arith.constant 0 : i32
    %c0_i32_0 = arith.constant 0 : i32
    return %arg0, %c0_i32 : i32, i32
  }
  func.func @transform_1(%arg0: i32) -> (i32, i32) {
    %c0_i32 = arith.constant 0 : i32
    %c0_i32_0 = arith.constant 0 : i32
    %c0_i32_1 = arith.constant 0 : i32
    return %c0_i32, %c0_i32_0 : i32, i32
  }
  func.func @transform_2(%arg0: i32) -> (i32, i32) {
    %c0_i32 = arith.constant 0 : i32
    %c0_i32_0 = arith.constant 0 : i32
    %c0_i32_1 = arith.constant 0 : i32
    return %c0_i32, %c0_i32_0 : i32, i32
  }
  func.func @transform_3(%arg0: i32) -> (i32, i32) {
    %c0_i32 = arith.constant 0 : i32
    %c0_i32_0 = arith.constant 0 : i32
    %c0_i32_1 = arith.constant 0 : i32
    return %c0_i32, %c0_i32_0 : i32, i32
  }
  func.func @transform_4(%arg0: i32) -> (i32, i32) {
    %c0_i32 = arith.constant 0 : i32
    %c0_i32_0 = arith.constant 0 : i32
    %c0_i32_1 = arith.constant 0 : i32
    return %c0_i32, %c0_i32_0 : i32, i32
  }
  func.func @transform_5(%arg0: i32) -> (i32, i32) {
    %c0_i32 = arith.constant 0 : i32
    %c0_i32_0 = arith.constant 0 : i32
    return %arg0, %c0_i32 : i32, i32
  }
  func.func @transform_6(%arg0: i32) -> (i32, i32) {
    %c0_i32 = arith.constant 0 : i32
    %c0_i32_0 = arith.constant 0 : i32
    return %arg0, %c0_i32 : i32, i32
  }
}

</mosaic_0001>

<bundles_post_ra>
// kernel: tpu_custom_call.1
= control target key start
LH: loop header
LB: loop body
LE: loop exit
PB: predicated region body
PF: predicated region fallthrough
CT: control target
= control target key end

     0   :  { %11 = vsyncpa [#allocation3], 0  ;;  %s638_s0 = inlined_call_operand.hbm [shape: bf16[16,16], index: 0, kind: input, shape index: {}]   ;;  %s639_s1 = inlined_call_operand.hbm [shape: bf16[16,128], index: 1, kind: input, shape index: {}]   ;;  %s640_s2 = inlined_call_operand.vmem [shape: f32[1,128], index: 2, kind: input, shape index: {}]   ;;  %s641_s3 = inlined_call_operand.hbm [shape: bf16[128,256], index: 3, kind: input, shape index: {}]   ;;  %s642_s4 = inlined_call_operand.vmem [shape: f32[1,256], index: 4, kind: input, shape index: {}]   ;;  %s643_s5 = inlined_call_operand.hbm [shape: f32[16,256], index: 5, kind: input, shape index: {}]   ;;  %s644_s6 = inlined_call_operand.hbm [shape: bf16[16,256], index: 6, kind: output, shape index: {}]  }
   0x1   :  { %12 = vsyncpa [#allocation6], 0 }
   0x2   :  { %13 = vsyncpa [#allocation9], 0 }
   0x3   :  { %14 = vsyncpa [#allocation4], 0  ;;  %s32_s23 = sshll.u32 %s639_s1, 4  ;;  %s560_s24 = smov [#allocation5]   ;;  %s33_s23 = int_to_ptr.hbm [resolvable:$true] %s32_s23 }
   0x4   :  { %s34_s25 = sshll.u32 %s560_s24, 4  ;;  %s19_s28 = sshll.u32 %s638_s0, 4  ;;  %s35_s25 = int_to_ptr.vmem [resolvable:$true] %s34_s25  ;;  %s20_s28 = int_to_ptr.hbm [resolvable:$true] %s19_s28 }
   0x5   :  { %s561_s29 = smov 64   ;;  %s562_s30 = smov 4  }
   0x6   :  { %40 = dma.hbm_to_vmem [thread:$0]  %s33_s23, 128, %s35_s25, [#allocation6], %s561_s29, %s561_s29, %s562_s30  }
   0x7   :  { %s563_s7 = smov [#allocation2]   ;;  %s47_s11 = sshll.u32 %s641_s3, 4  ;;  %s48_s11 = int_to_ptr.hbm [resolvable:$true] %s47_s11 }
   0x8   :  { %s21_s8 = sshll.u32 %s563_s7, 4  ;;  %s564_s1 = smov [#allocation7]   ;;  %s22_s8 = int_to_ptr.vmem [resolvable:$true] %s21_s8 }
   0x9   :  { %27 = dma.hbm_to_vmem [thread:$0]  %s20_s28, 128, %s22_s8, [#allocation3], %s561_s29, %s561_s29, %s562_s30  }
   0xa   :  { %s49_s12 = sshll.u32 %s564_s1, 4  ;;  %s62_s0 = sshll.u32 %s643_s5, 4  ;;  %s50_s12 = int_to_ptr.vmem [resolvable:$true] %s49_s12  ;;  %s63_s0 = int_to_ptr.hbm [resolvable:$true] %s62_s0 }
   0xb   :  { %s565_s15 = smov 128   ;;  %s566_s16 = smov 8  }
   0xc   :  { %55 = dma.hbm_to_vmem [thread:$0]  %s48_s11, 2048, %s50_s12, [#allocation6], %s565_s15, %s565_s15, %s566_s16  }
   0xd   :  { %s567_s17 = smov [#allocation8]   ;;  %s568_s3 = smov 256  }
   0xe   :  { %s64_s18 = sshll.u32 %s567_s17, 4  ;;  %s569_s19 = smov 16   ;;  %s65_s18 = int_to_ptr.vmem [resolvable:$true] %s64_s18 }
   0xf   :  { %70 = dma.hbm_to_vmem [thread:$0]  %s63_s0, 512, %s65_s18, [#allocation9], %s568_s3, %s568_s3, %s569_s19  }
  0x10   :  { %552 = dma.done.wait [#allocation3], 128  }
  0x11   :  { %553 = vsyncadd [#allocation3], 4294967168 }
  0x12   :  { %554 = dma.done.wait [#allocation6], 2176  }
  0x13   :  { %555 = vsyncadd [#allocation6], 4294965120 }
  0x14   :  { %556 = dma.done.wait [#allocation9], 512  }
  0x15   :  { %557 = vsyncadd [#allocation9], 4294966784  ;;  %v401_v0 = vld [vmem:[#allocation5] sm:$0xff]  ;;  %v400_v1 = vld [vmem:[#allocation2] sm:$0xff]  ;;  %vm107_vm0 = vcmask 130048   ;;  %vm571_vm3 = vmmov 1  }
  0x16   :  { %v390_v2 = vld [vmem:[#allocation7 + $0x70] sm:$0xf]  ;;  %v417_v3 = vld [vmem:[#allocation7 + $0x74] sm:$0xf0]  ;;  %v416_v4 = vld [vmem:[#allocation7 + $0x74] sm:$0xf]  ;;  %118 = vmatpush.bf16.msra.mxu0 %v401_v0 }
  0x17   :  { %v392_v5 = vld [vmem:[#allocation7 + $0x78] sm:$0xf0]  ;;  %v391_v6 = vor.u32 %v417_v3, %v390_v2  ;;  %v382_v8 = vld [vmem:[#allocation7 + $0x60] sm:$0xf]  ;;  %v415_v9 = vld [vmem:[#allocation7 + $0x64] sm:$0xf0] }
  0x18   :  { %v395_v7 = vor.u32 %v416_v4, %v392_v5  ;;  %v414_v10 = vld [vmem:[#allocation7 + $0x64] sm:$0xf]  ;;  %v384_v11 = vld [vmem:[#allocation7 + $0x68] sm:$0xf0]  ;;  %v383_v12 = vor.u32 %v415_v9, %v382_v8  ;;  %v374_v14 = vld [vmem:[#allocation7 + $0x50] sm:$0xf] }
  0x19   :  { %230 = vmatpush.bf16.msra.mxu1 %v391_v6  ;;  %v387_v13 = vor.u32 %v414_v10, %v384_v11  ;;  %331 = vmatmul.msk.bf16.vlgmr.msra.gmra.mxu0 %vm107_vm0, %v400_v1  ;;  %v413_v15 = vld [vmem:[#allocation7 + $0x54] sm:$0xf0]  ;;  %v412_v16 = vld [vmem:[#allocation7 + $0x54] sm:$0xf]  ;;  %v376_v17 = vld [vmem:[#allocation7 + $0x58] sm:$0xf0] }
  0x1a   :  { %244 = vmatpush.bf16.msra.mxu2 %v395_v7  ;;  %v375_v18 = vor.u32 %v413_v15, %v374_v14  ;;  %v379_v19 = vor.u32 %v412_v16, %v376_v17  ;;  %v366_v20 = vld [vmem:[#allocation7 + $0x40] sm:$0xf]  ;;  %v411_v21 = vld [vmem:[#allocation7 + $0x44] sm:$0xf0]  ;;  %v410_v22 = vld [vmem:[#allocation7 + $0x44] sm:$0xf] }
  0x1b   :  { %v368_v23 = vld [vmem:[#allocation7 + $0x48] sm:$0xf0]  ;;  %v367_v24 = vor.u32 %v411_v21, %v366_v20  ;;  %v358_v26 = vld [vmem:[#allocation7 + $0x30] sm:$0xf]  ;;  %v409_v27 = vld [vmem:[#allocation7 + $0x34] sm:$0xf0] }
  0x1c   :  { %v371_v25 = vor.u32 %v410_v22, %v368_v23  ;;  %v408_v28 = vld [vmem:[#allocation7 + $0x34] sm:$0xf]  ;;  %v359_v29 = vor.u32 %v409_v27, %v358_v26  ;;  %v360_v30 = vld [vmem:[#allocation7 + $0x38] sm:$0xf0]  ;;  %v350_v32 = vld [vmem:[#allocation7 + $0x20] sm:$0xf] }
  0x1d   :  { %231 = vmatpush.bf16.msra.mxu1 %v383_v12  ;;  %v363_v31 = vor.u32 %v408_v28, %v360_v30  ;;  %v407_v33 = vld [vmem:[#allocation7 + $0x24] sm:$0xf0]  ;;  %v406_v34 = vld [vmem:[#allocation7 + $0x24] sm:$0xf]  ;;  %v352_v36 = vld [vmem:[#allocation7 + $0x28] sm:$0xf0] }
  0x1e   :  { %245 = vmatpush.bf16.msra.mxu2 %v387_v13  ;;  %v351_v35 = vor.u32 %v407_v33, %v350_v32  ;;  %v355_v37 = vor.u32 %v406_v34, %v352_v36  ;;  %v342_v38 = vld [vmem:[#allocation7 + $0x10] sm:$0xf]  ;;  %v405_v39 = vld [vmem:[#allocation7 + $0x14] sm:$0xf0]  ;;  %v404_v40 = vld [vmem:[#allocation7 + $0x14] sm:$0xf] }
  0x1f   :  { %v343_v41 = vor.u32 %v405_v39, %v342_v38  ;;  %v344_v42 = vld [vmem:[#allocation7 + $0x18] sm:$0xf0]  ;;  %v334_v44 = vld [vmem:[#allocation7] sm:$0xf]  ;;  %v403_v45 = vld [vmem:[#allocation7 + $0x4] sm:$0xf0] }
  0x20   :  { %v347_v43 = vor.u32 %v404_v40, %v344_v42  ;;  %v402_v46 = vld [vmem:[#allocation7 + $0x4] sm:$0xf]  ;;  %v335_v47 = vor.u32 %v403_v45, %v334_v44  ;;  %v336_v48 = vld [vmem:[#allocation7 + $0x8] sm:$0xf0]  ;;  %v431_v51 = vld [vmem:[%s640_s2] ss:$0 sm:$0xff] }
  0x21   :  { %232 = vmatpush.bf16.msra.mxu1 %v375_v18  ;;  %v339_v49 = vor.u32 %v402_v46, %v336_v48  ;;  %v144_v58 = vld [vmem:[%s642_s4] sm:$0x3]  ;;  %v258_v63 = vld [vmem:[#allocation8] sm:$0xff]  ;;  %v259_v1 = vld [vmem:[#allocation8 + $0x8] sm:$0xff]  ;;  %v570_v8 = vmov 0.0   ;;  %s572_s2 = smov [#allocation10]  }
  0x22   :  { %246 = vmatpush.bf16.msra.mxu2 %v379_v19  ;;  %v146_v60 = vperm.slane %v144_v58, 0  ;;  %v147_v61 = vperm.slane %v144_v58, 1  ;;  %v260_v10 = vld [vmem:[#allocation8 + $0x10] sm:$0xff]  ;;  %v261_v12 = vld [vmem:[#allocation8 + $0x18] sm:$0xff]  ;;  %s306_s4 = sshll.u32 %s572_s2, 4  ;;  %s308_s25 = sshll.u32 %s644_s6, 4  ;;  %s307_s4 = int_to_ptr.vmem [resolvable:$true] %s306_s4  ;;  %s309_s25 = int_to_ptr.hbm [resolvable:$true] %s308_s25 }
  0x25   :  { %233 = vmatpush.bf16.msra.mxu1 %v367_v24 }
  0x26   :  { %247 = vmatpush.bf16.msra.mxu2 %v371_v25 }
  0x29   :  { %234 = vmatpush.bf16.msra.mxu1 %v359_v29 }
  0x2a   :  { %248 = vmatpush.bf16.msra.mxu2 %v363_v31 }
  0x2d   :  { %235 = vmatpush.bf16.msra.mxu1 %v351_v35 }
  0x2e   :  { %249 = vmatpush.bf16.msra.mxu2 %v355_v37 }
  0x31   :  { %236 = vmatpush.bf16.msra.mxu1 %v343_v41 }
  0x32   :  { %250 = vmatpush.bf16.msra.mxu2 %v347_v43 }
  0x35   :  { %237 = vmatpush.bf16.msra.mxu1 %v335_v47 }
  0x36   :  { %251 = vmatpush.bf16.msra.mxu2 %v339_v49 }
  0x96   :  { %v120_v50 = vpop.f32.mrf.mxu0 }
  0x97   :  { %v121_v52 = vadd.f32 %v431_v51, %v120_v50 }
  0x99   :  { %v125_v55 = vmax.f32 %v121_v52, 0.0 }
  0x9e   :  { %v122_v53 = vpop.f32.mrf.mxu0 }
  0x9f   :  { %v123_v54 = vadd.f32 %v431_v51, %v122_v53 }
  0xa1   :  { %v126_v56 = vmax.f32 %v123_v54, 0.0 }
  0xa3   :  { %v127_v57 = vpack.c.bf16 %v126_v56, %v125_v55 }
  0xa5   :  { %238 = vmatmul.bf16.vlgmr.msra.gmra.mxu1 %v127_v57  ;;  %252 = vmatmul.bf16.vlgmr.msra.gmra.mxu2 %v127_v57 }
 0x122   :  { %v239_v59 = vpop.f32.mrf.mxu1 }
 0x123   :  { %v240_v62 = vadd.f32 %v239_v59, %v146_v60 }
 0x125   :  { %v262_v3 = vadd.f32 %v258_v63, %v240_v62 }
 0x128   :  { %v253_v0 = vpop.f32.mrf.mxu2 }
 0x129   :  { %v254_v2 = vadd.f32 %v253_v0, %v147_v61 }
 0x12a   :  { %v241_v5 = vpop.f32.mrf.mxu1 }
 0x12b   :  { %v263_v4 = vadd.f32 %v259_v1, %v254_v2  ;;  %v242_v7 = vadd.f32 %v241_v5, %v146_v60 }
 0x12d   :  { %v266_v6 = vmax.f32 %v262_v3, %v263_v4  ;;  %v264_v17 = vadd.f32 %v260_v10, %v242_v7 }
 0x12f   :  { %vm268_vm1 = vcmp.eq.f32.partialorder %v262_v3, %v266_v6  ;;  %vm276_vm2 = vcmp.eq.f32.partialorder %v263_v4, %v266_v6 }
 0x130   :  { %v396_v9 = vsel %vm268_vm1, 1.0, %v570_v8  ;;  %vm278_vm4 = vmxor %vm268_vm1, %vm571_vm3  ;;  %v255_v11 = vpop.f32.mrf.mxu2 }
 0x131   :  { %v274_v13 = vpack.c.bf16 %v396_v9, %v396_v9  ;;  %vm280_vm5 = vmand %vm276_vm2, %vm278_vm4  ;;  %v256_v14 = vadd.f32 %v255_v11, %v147_v61 }
 0x132   :  { %v398_v15 = vsel %vm280_vm5, 1.0, %v570_v8 }
 0x133   :  { %v286_v16 = vpack.c.bf16 %v398_v15, %v398_v15  ;;  %v265_v18 = vadd.f32 %v261_v12, %v256_v14  ;;  %v290_v19 = vunpack.c.l.b16 %v274_v13 }
 0x135   :  { %v294_v20 = vunpack.c.l.b16 %v286_v16  ;;  %v267_v21 = vmax.f32 %v264_v17, %v265_v18 }
 0x137   :  { %vm269_vm6 = vcmp.eq.f32.partialorder %v264_v17, %v267_v21  ;;  %vm277_vm7 = vcmp.eq.f32.partialorder %v265_v18, %v267_v21  ;;  %v296_v22 = vpack.c.b16 %v294_v20, %v290_v19 }
 0x138   :  { %v397_v23 = vsel %vm269_vm6, 1.0, %v570_v8  ;;  %vm279_vm8 = vmxor %vm269_vm6, %vm571_vm3 }
 0x139   :  { %v275_v24 = vpack.c.bf16 %v397_v23, %v397_v23  ;;  %vm281_vm9 = vmand %vm277_vm7, %vm279_vm8  ;;  %300 = vst [vmem:[#allocation10] sm:$0xff] %v296_v22 }
 0x13a   :  { %v399_v25 = vsel %vm281_vm9, 1.0, %v570_v8 }
 0x13b   :  { %v287_v26 = vpack.c.bf16 %v399_v25, %v399_v25  ;;  %v291_v27 = vunpack.c.l.b16 %v275_v24 }
 0x13d   :  { %v295_v28 = vunpack.c.l.b16 %v287_v26 }
 0x13f   :  { %v297_v29 = vpack.c.b16 %v295_v28, %v291_v27 }
 0x141   :  { %301 = vst [vmem:[#allocation10 + $0x8] sm:$0xff] %v297_v29 }
 0x142   :  { %314 = dma.vmem_to_hbm [thread:$0]  %s307_s4, 256, %s309_s25, [#allocation4], %s565_s15, %s565_s15, %s566_s16  }
 0x143   :  { %558 = dma.done.wait [#allocation4], 256  }
 0x144   :  { %559 = vsyncadd [#allocation4], 4294967040 }
 0x145   :  { %319 = vsyncpa [#allocation3], 1 }
 0x146   :  { %320 = vsyncpa [#allocation6], 1 }
 0x147   :  { %321 = vsyncpa [#allocation9], 1 }
 0x148   :  { %322 = vsyncpa [#allocation4], 1 }

</bundles_post_ra>
